<compile_context>
chip_gen: v7x
topology: tpu7x:2x2x1
jax: 0.10.0
libtpu: 0.0.40
codegen_flags: <defaults>
</compile_context>

<pallas_src>
import jax
import jax.numpy as jnp
from jax import lax
from jax.experimental import pallas as pl
from jax.experimental.pallas import tpu as pltpu

C_OUT = 3          # conv output channels
K = 3              # conv kernel size
H_IN = W_IN = 10   # input spatial size (=> 8x8 conv output, 3*8*8 = 192 feats)
H_OUT = W_OUT = 8
N_FEAT = C_OUT * H_OUT * W_OUT   # 192 (Linear in_features)
N_CLASSES = 10                   # Linear out_features

# Lane-padded sizes (multiples of 128 -> unmasked loads/stores, exact math via 0-pad).
X_PAD = 128        # >= 100 flattened input pixels
FEAT_PAD = 256     # >= 192 conv features
OUT_PAD = 128      # >= 10 logits


def _net_kernel(x_ref, t_ref, wl_ref, conv_ref, y_ref):
    """Two MXU matmuls, no in-kernel VPU/XLU work.

    x_ref:    (1, 128)   VMEM f32 -- flattened input plane (cols >= 100 are zero)
    t_ref:    (128, 256) VMEM f32 -- im2col/Toeplitz conv operator (zero padded)
    wl_ref:   (256, 128) VMEM f32 -- linear weight, pre-transposed + zero padded
    conv_ref: (1, 256)   VMEM f32 out -- conv feats, torch (c,h,w) order in cols :192
    y_ref:    (1, 128)   VMEM f32 out -- logits in cols :10
    """
    conv = lax.dot_general(
        x_ref[...], t_ref[...],
        dimension_numbers=(((1,), (0,)), ((), ())),
        preferred_element_type=jnp.float32)               # (1, 256), lane dense
    conv_ref[...] = conv
    y_ref[...] = lax.dot_general(
        conv, wl_ref[...],
        dimension_numbers=(((1,), (0,)), ((), ())),
        preferred_element_type=jnp.float32)               # (1, 128)


def _build_conv_operator(conv_w):
    """(100, 192) Toeplitz matrix T so that x_flat @ T == valid-conv(x, conv_w)
    flattened in torch NCHW (c, h, w) order.
    T[(oh+kh)*10 + (ow+kw), c*64 + oh*8 + ow] = conv_w[c, 0, kh, kw]."""
    w = conv_w[:, 0].astype(jnp.float32)                  # (3, 3, 3)
    C, KH, KW, OH, OW = jnp.meshgrid(
        jnp.arange(C_OUT), jnp.arange(K), jnp.arange(K),
        jnp.arange(H_OUT), jnp.arange(W_OUT), indexing="ij")
    rows = ((OH + KH) * W_IN + (OW + KW)).reshape(-1)     # input flat index
    cols = (C * (H_OUT * W_OUT) + OH * W_OUT + OW).reshape(-1)  # output flat index
    vals = w[C, KH, KW].reshape(-1)
    T = jnp.zeros((H_IN * W_IN, N_FEAT), jnp.float32)
    return T.at[rows, cols].set(vals)                     # each (row, col) unique


@jax.jit
def net_forward(x, conv_w, lin_w):
    """x: (1,1,10,10) f32 NCHW; conv_w: (3,1,3,3) OIHW; lin_w: (10,192).
    Returns (x1, x2) matching the PyTorch module: x1 (192, 1), x2 (10,)."""
    x_flat = x.reshape(1, H_IN * W_IN).astype(jnp.float32)              # (1, 100)
    x_pad = jnp.pad(x_flat, ((0, 0), (0, X_PAD - H_IN * W_IN)))         # (1, 128)

    T = _build_conv_operator(conv_w)                                    # (100, 192)
    t_pad = jnp.pad(T, ((0, X_PAD - H_IN * W_IN), (0, FEAT_PAD - N_FEAT)))

    wl_t = lin_w.astype(jnp.float32).T                                  # (192, 10)
    wl_pad = jnp.pad(wl_t, ((0, FEAT_PAD - N_FEAT), (0, OUT_PAD - N_CLASSES)))

    conv_pad, y_pad = pl.pallas_call(
        _net_kernel,
        out_shape=(
            jax.ShapeDtypeStruct((1, FEAT_PAD), jnp.float32),   # padded conv feats
            jax.ShapeDtypeStruct((1, OUT_PAD), jnp.float32),    # padded logits
        ),
        in_specs=[
            pl.BlockSpec(memory_space=pltpu.MemorySpace.VMEM),  # x (1, 128)
            pl.BlockSpec(memory_space=pltpu.MemorySpace.VMEM),  # T (128, 256)
            pl.BlockSpec(memory_space=pltpu.MemorySpace.VMEM),  # W_l^T (256, 128)
        ],
        out_specs=(
            pl.BlockSpec(memory_space=pltpu.MemorySpace.VMEM),
            pl.BlockSpec(memory_space=pltpu.MemorySpace.VMEM),
        ),
    )(x_pad, t_pad, wl_pad)

    # Wrapper-side slice/reshape back to the module's shapes (pure layout plumbing).
    x1 = conv_pad[0, :N_FEAT].reshape(-1, 1)   # (192, 1), torch NCHW flatten order
    x2 = y_pad[0, :N_CLASSES]                  # (10,)
    return x1, x2


def _reference(x, conv_w, lin_w):
    """Pure-JAX reference of the ideal forward pass for a correctness check."""
    conv = lax.conv_general_dilated(
        x, conv_w, window_strides=(1, 1), padding="VALID",
        dimension_numbers=("NCHW", "OIHW", "NCHW"))       # (1, 3, 8, 8)
    x1 = conv.reshape(-1, 1)                              # (192, 1)
    x2 = (lin_w @ x1).reshape(-1)                         # (10,)
    return x1, x2


if __name__ == "__main__":
    key = jax.random.PRNGKey(0)
    kx, kc, kl = jax.random.split(key, 3)

    # Deterministic synthetic parameters (shapes implied by the module __init__).
    x = jax.random.normal(kx, (1, 1, H_IN, W_IN), jnp.float32)
    conv_w = jax.random.normal(kc, (C_OUT, 1, K, K), jnp.float32) * 0.1
    lin_w = jax.random.normal(kl, (N_CLASSES, N_FEAT), jnp.float32) * 0.1

    x1, x2 = net_forward(x, conv_w, lin_w)
    jax.block_until_ready((x1, x2))

    x1_ref, x2_ref = _reference(x, conv_w, lin_w)
    assert x1.shape == (N_FEAT, 1) and x2.shape == (N_CLASSES,)
    assert jnp.allclose(x1, x1_ref, atol=1e-5, rtol=1e-5)
    assert jnp.allclose(x2, x2_ref, atol=1e-5, rtol=1e-5)

    print("KERNEL_OK")
</pallas_src>

<mosaic_0001>
module attributes {stable_mosaic.version = 11 : i64} {
  func.func @_net_kernel(%arg0: memref<1x128xf32, #tpu.memory_space<vmem>>, %arg1: memref<128x256xf32, #tpu.memory_space<vmem>>, %arg2: memref<256x128xf32, #tpu.memory_space<vmem>>, %arg3: memref<1x256xf32, #tpu.memory_space<vmem>>, %arg4: memref<1x128xf32, #tpu.memory_space<vmem>>) attributes {dimension_semantics = [], scalar_prefetch = 0 : i64, scratch_operands = 0 : i64, tpu.core_type = #tpu.core_type<tc>} {
    %c0 = arith.constant 0 : index
    %c0_0 = arith.constant 0 : index
    %0 = vector.load %arg0[%c0, %c0_0] : memref<1x128xf32, #tpu.memory_space<vmem>>, vector<1x128xf32>
    %c0_1 = arith.constant 0 : index
    %c0_2 = arith.constant 0 : index
    %1 = vector.load %arg1[%c0_1, %c0_2] : memref<128x256xf32, #tpu.memory_space<vmem>>, vector<128x256xf32>
    %cst = arith.constant dense<0.000000e+00> : vector<1x256xf32>
    %2 = tpu.matmul %0, %1, %cst {dimension_numbers = #tpu.dot_dimension_numbers<[1], [0], [0], [1], [0, 0, 1, 1], [], []>} : vector<1x128xf32>, vector<128x256xf32>, vector<1x256xf32> -> vector<1x256xf32>
    %c0_3 = arith.constant 0 : index
    %c0_4 = arith.constant 0 : index
    %3 = vector.load %arg3[%c0_3, %c0_4] : memref<1x256xf32, #tpu.memory_space<vmem>>, vector<1x256xf32>
    tpu.vector_store %arg3[%c0_3, %c0_4], %2 {strides = array<i32>} : memref<1x256xf32, #tpu.memory_space<vmem>>, vector<1x256xf32>,
    %c0_5 = arith.constant 0 : index
    %c0_6 = arith.constant 0 : index
    %4 = vector.load %arg2[%c0_5, %c0_6] : memref<256x128xf32, #tpu.memory_space<vmem>>, vector<256x128xf32>
    %cst_7 = arith.constant dense<0.000000e+00> : vector<1x128xf32>
    %5 = tpu.matmul %2, %4, %cst_7 {dimension_numbers = #tpu.dot_dimension_numbers<[1], [0], [0], [1], [0, 0, 1, 1], [], []>} : vector<1x256xf32>, vector<256x128xf32>, vector<1x128xf32> -> vector<1x128xf32>
    %c0_8 = arith.constant 0 : index
    %c0_9 = arith.constant 0 : index
    %6 = vector.load %arg4[%c0_8, %c0_9] : memref<1x128xf32, #tpu.memory_space<vmem>>, vector<1x128xf32>
    tpu.vector_store %arg4[%c0_8, %c0_9], %5 {strides = array<i32>} : memref<1x128xf32, #tpu.memory_space<vmem>>, vector<1x128xf32>,
    return
  }
}

</mosaic_0001>

<bundles_post_ra>
// kernel: net_forward.1
= control target key start
LH: loop header
LB: loop body
LE: loop exit
PB: predicated region body
PF: predicated region fallthrough
CT: control target
= control target key end

     0   :  { %v355_v3 = vmov 0.0   ;;  %s583_s1 = inlined_call_operand.vmem [shape: f32[128,256], index: 1, kind: input, shape index: {}]   ;;  %s584_s2 = inlined_call_operand.vmem [shape: f32[256,128], index: 2, kind: input, shape index: {}]   ;;  %s585_s0 = inlined_call_operand.vmem [shape: f32[1,128], index: 0, kind: input, shape index: {}]   ;;  %s586_s3 = inlined_call_operand.vmem [shape: f32[1,256], index: 3, kind: output, shape index: {0}]   ;;  %s587_s4 = inlined_call_operand.vmem [shape: f32[1,128], index: 4, kind: output, shape index: {1}]  }
   0x1   :  { %v18_v0 = vld [vmem:[%s583_s1 + $0x8] sm:$0xff]  ;;  %v20_v1 = vld [vmem:[%s583_s1 + $0x18] sm:$0xff]  ;;  %v17_v2 = vld [vmem:[%s583_s1] sm:$0xff]  ;;  %113 = vmatprep.mubr.f32.mxu0 %v355_v3 }
   0x2   :  { %v289_v4 = vpack.c.bf16 %v20_v1, %v18_v0  ;;  %v19_v5 = vld [vmem:[%s583_s1 + $0x10] sm:$0xff]  ;;  %v22_v6 = vld [vmem:[%s583_s1 + $0x28] sm:$0xff]  ;;  %v24_v7 = vld [vmem:[%s583_s1 + $0x38] sm:$0xff] }
   0x3   :  { %v291_v8 = vpack.c.bf16 %v19_v5, %v17_v2  ;;  %v293_v9 = vpack.c.bf16 %v24_v7, %v22_v6  ;;  %v21_v10 = vld [vmem:[%s583_s1 + $0x20] sm:$0xff]  ;;  %v23_v11 = vld [vmem:[%s583_s1 + $0x30] sm:$0xff]  ;;  %v26_v12 = vld [vmem:[%s583_s1 + $0x48] sm:$0xff] }
   0x4   :  { %290 = vmatprep.subr.bf16.mxu0 %v289_v4  ;;  %v28_v13 = vld [vmem:[%s583_s1 + $0x58] sm:$0xff]  ;;  %v295_v14 = vpack.c.bf16 %v23_v11, %v21_v10  ;;  %v25_v16 = vld [vmem:[%s583_s1 + $0x40] sm:$0xff]  ;;  %v27_v17 = vld [vmem:[%s583_s1 + $0x50] sm:$0xff] }
   0x5   :  { %292 = vmatpush1.bf16.msra.mxu0 %v291_v8  ;;  %v297_v15 = vpack.c.bf16 %v28_v13, %v26_v12  ;;  %v30_v18 = vld [vmem:[%s583_s1 + $0x68] sm:$0xff]  ;;  %v32_v19 = vld [vmem:[%s583_s1 + $0x78] sm:$0xff]  ;;  %v299_v20 = vpack.c.bf16 %v27_v17, %v25_v16  ;;  %v29_v22 = vld [vmem:[%s583_s1 + $0x60] sm:$0xff] }
   0x6   :  { %294 = vmatprep.subr.bf16.mxu0 %v293_v9  ;;  %v301_v21 = vpack.c.bf16 %v32_v19, %v30_v18  ;;  %v31_v23 = vld [vmem:[%s583_s1 + $0x70] sm:$0xff]  ;;  %v34_v24 = vld [vmem:[%s583_s1 + $0x88] sm:$0xff]  ;;  %v36_v25 = vld [vmem:[%s583_s1 + $0x98] sm:$0xff] }
   0x7   :  { %v33_v26 = vld [vmem:[%s583_s1 + $0x80] sm:$0xff]  ;;  %v35_v27 = vld [vmem:[%s583_s1 + $0x90] sm:$0xff]  ;;  %v160_v29 = vld [vmem:[%s584_s2 + $0x88] sm:$0xff]  ;;  %v303_v31 = vpack.c.bf16 %v31_v23, %v29_v22  ;;  %v305_v36 = vpack.c.bf16 %v36_v25, %v34_v24 }
   0x8   :  { %v159_v28 = vld [vmem:[%s584_s2 + $0x80] sm:$0xff]  ;;  %v144_v33 = vld [vmem:[%s584_s2 + $0x8] sm:$0xff]  ;;  %v161_v34 = vld [vmem:[%s584_s2 + $0x90] sm:$0xff]  ;;  %v307_v46 = vpack.c.bf16 %v35_v27, %v33_v26 }
   0x9   :  { %296 = vmatpush1.bf16.msra.mxu0 %v295_v14  ;;  %v143_v30 = vld [vmem:[%s584_s2] sm:$0xff]  ;;  %v321_v32 = vpack.c.bf16 %v160_v29, %v159_v28  ;;  %v162_v35 = vld [vmem:[%s584_s2 + $0x98] sm:$0xff]  ;;  %v145_v39 = vld [vmem:[%s584_s2 + $0x10] sm:$0xff] }
   0xa   :  { %298 = vmatprep.subr.bf16.mxu0 %v297_v15  ;;  %v323_v37 = vpack.c.bf16 %v144_v33, %v143_v30  ;;  %v325_v38 = vpack.c.bf16 %v162_v35, %v161_v34  ;;  %v146_v40 = vld [vmem:[%s584_s2 + $0x18] sm:$0xff]  ;;  %v163_v41 = vld [vmem:[%s584_s2 + $0xa0] sm:$0xff]  ;;  %v38_v42 = vld [vmem:[%s583_s1 + $0xa8] sm:$0xff]  ;;  %v356_v34 = vmov 1966171168  }
   0xb   :  { %v40_v43 = vld [vmem:[%s583_s1 + $0xb8] sm:$0xff]  ;;  %322 = vmatprep.subr.bf16.mxu1 %v321_v32  ;;  %v164_v44 = vld [vmem:[%s584_s2 + $0xa8] sm:$0xff]  ;;  %v327_v45 = vpack.c.bf16 %v146_v40, %v145_v39  ;;  %v37_v47 = vld [vmem:[%s583_s1 + $0xa0] sm:$0xff]  ;;  %v124_v35 = vunpack.c.l.s4 %v356_v34 }
   0xc   :  { %324 = vmatpush3.bf16.msra.mxu1 %v323_v37  ;;  %v329_v48 = vpack.c.bf16 %v164_v44, %v163_v41  ;;  %v147_v49 = vld [vmem:[%s584_s2 + $0x20] sm:$0xff]  ;;  %v148_v50 = vld [vmem:[%s584_s2 + $0x28] sm:$0xff]  ;;  %v309_v51 = vpack.c.bf16 %v40_v43, %v38_v42  ;;  %v39_v52 = vld [vmem:[%s583_s1 + $0xb0] sm:$0xff] }
   0xd   :  { %300 = vmatpush1.bf16.msra.mxu0 %v299_v20  ;;  %326 = vmatprep.subr.bf16.mxu1 %v325_v38  ;;  %v165_v53 = vld [vmem:[%s584_s2 + $0xb0] sm:$0xff]  ;;  %v166_v54 = vld [vmem:[%s584_s2 + $0xb8] sm:$0xff]  ;;  %v42_v55 = vld [vmem:[%s583_s1 + $0xc8] sm:$0xff]  ;;  %v331_v57 = vpack.c.bf16 %v148_v50, %v147_v49  ;;  %v311_v58 = vpack.c.bf16 %v39_v52, %v37_v47  ;;  %v125_v37 = vunpack.c.0.s8 %v124_v35 }
   0xe   :  { %302 = vmatprep.subr.bf16.mxu0 %v301_v21  ;;  %v44_v56 = vld [vmem:[%s583_s1 + $0xd8] sm:$0xff]  ;;  %v41_v59 = vld [vmem:[%s583_s1 + $0xc0] sm:$0xff]  ;;  %v333_v60 = vpack.c.bf16 %v166_v54, %v165_v53  ;;  %v149_v61 = vld [vmem:[%s584_s2 + $0x30] sm:$0xff] }
   0xf   :  { %v150_v62 = vld [vmem:[%s584_s2 + $0x38] sm:$0xff]  ;;  %v313_v63 = vpack.c.bf16 %v44_v56, %v42_v55  ;;  %v43_v0 = vld [vmem:[%s583_s1 + $0xd0] sm:$0xff]  ;;  %v167_v1 = vld [vmem:[%s584_s2 + $0xc0] sm:$0xff] }
  0x10   :  { %328 = vmatpush3.bf16.msra.mxu1 %v327_v45  ;;  %v168_v2 = vld [vmem:[%s584_s2 + $0xc8] sm:$0xff]  ;;  %v48_v4 = vld [vmem:[%s583_s1 + $0xf8] sm:$0xff]  ;;  %v335_v5 = vpack.c.bf16 %v150_v62, %v149_v61  ;;  %v315_v6 = vpack.c.bf16 %v43_v0, %v41_v59  ;;  %v45_v7 = vld [vmem:[%s583_s1 + $0xe0] sm:$0xff] }
  0x11   :  { %304 = vmatpush1.bf16.msra.mxu0 %v303_v31  ;;  %330 = vmatprep.subr.bf16.mxu1 %v329_v48  ;;  %v46_v3 = vld [vmem:[%s583_s1 + $0xe8] sm:$0xff]  ;;  %v337_v8 = vpack.c.bf16 %v168_v2, %v167_v1  ;;  %v151_v9 = vld [vmem:[%s584_s2 + $0x40] sm:$0xff]  ;;  %v47_v12 = vld [vmem:[%s583_s1 + $0xf0] sm:$0xff] }
  0x12   :  { %306 = vmatprep.subr.bf16.mxu0 %v305_v36  ;;  %v152_v10 = vld [vmem:[%s584_s2 + $0x48] sm:$0xff]  ;;  %v317_v11 = vpack.c.bf16 %v48_v4, %v46_v3  ;;  %v169_v13 = vld [vmem:[%s584_s2 + $0xd0] sm:$0xff]  ;;  %v170_v14 = vld [vmem:[%s584_s2 + $0xd8] sm:$0xff]  ;;  %v319_v16 = vpack.c.bf16 %v47_v12, %v45_v7  ;;  %v126_v36 = vlaneseq }
  0x13   :  { %v339_v15 = vpack.c.bf16 %v152_v10, %v151_v9  ;;  %v341_v17 = vpack.c.bf16 %v170_v14, %v169_v13  ;;  %v153_v18 = vld [vmem:[%s584_s2 + $0x50] sm:$0xff]  ;;  %v154_v19 = vld [vmem:[%s584_s2 + $0x58] sm:$0xff]  ;;  %v171_v20 = vld [vmem:[%s584_s2 + $0xe0] sm:$0xff] }
  0x14   :  { %332 = vmatpush3.bf16.msra.mxu1 %v331_v57  ;;  %v172_v21 = vld [vmem:[%s584_s2 + $0xe8] sm:$0xff]  ;;  %v343_v22 = vpack.c.bf16 %v154_v19, %v153_v18  ;;  %v16_v23 = vld [vmem:[%s585_s0] sm:$0x1]  ;;  %v173_v27 = vld [vmem:[%s584_s2 + $0xf0] sm:$0xff]  ;;  %v127_v38 = vshrl.u32 %v126_v36, 7  ;;  %vm140_vm0 = vcmp.lt.s32.totalorder %v126_v36, 256 }
  0x15   :  { %308 = vmatpush1.bf16.msra.mxu0 %v307_v46  ;;  %334 = vmatprep.subr.bf16.mxu1 %v333_v60  ;;  %v345_v24 = vpack.c.bf16 %v172_v21, %v171_v20  ;;  %v155_v25 = vld [vmem:[%s584_s2 + $0x60] sm:$0xff]  ;;  %v156_v26 = vld [vmem:[%s584_s2 + $0x68] sm:$0xff]  ;;  %v174_v28 = vld [vmem:[%s584_s2 + $0xf8] sm:$0xff] }
  0x16   :  { %310 = vmatprep.subr.bf16.mxu0 %v309_v51  ;;  %v347_v29 = vpack.c.bf16 %v156_v26, %v155_v25  ;;  %v349_v30 = vpack.c.bf16 %v174_v28, %v173_v27  ;;  %v157_v31 = vld [vmem:[%s584_s2 + $0x70] sm:$0xff]  ;;  %v158_v32 = vld [vmem:[%s584_s2 + $0x78] sm:$0xff]  ;;  %v128_v40 = vsub.s32 %v125_v37, %v127_v38 }
  0x17   :  { %v351_v33 = vpack.c.bf16 %v158_v32, %v157_v31 }
  0x18   :  { %336 = vmatpush3.bf16.msra.mxu1 %v335_v5 }
  0x19   :  { %312 = vmatpush1.bf16.msra.mxu0 %v311_v58  ;;  %338 = vmatprep.subr.bf16.mxu1 %v337_v8 }
  0x1a   :  { %314 = vmatprep.subr.bf16.mxu0 %v313_v63 }
  0x1c   :  { %340 = vmatpush3.bf16.msra.mxu1 %v339_v15 }
  0x1d   :  { %316 = vmatpush1.bf16.msra.mxu0 %v315_v6  ;;  %342 = vmatprep.subr.bf16.mxu1 %v341_v17 }
  0x1e   :  { %318 = vmatprep.subr.bf16.mxu0 %v317_v11 }
  0x20   :  { %344 = vmatpush3.bf16.msra.mxu1 %v343_v22 }
  0x21   :  { %320 = vmatpush1.bf16.msra.mxu0 %v319_v16  ;;  %346 = vmatprep.subr.bf16.mxu1 %v345_v24 }
  0x24   :  { %114 = vmatmul.mubr.f32.vlgmr.msra.gmra.mrb[0].mxu0 %v16_v23  ;;  %348 = vmatpush3.bf16.msra.mxu1 %v347_v29 }
  0x25   :  { %350 = vmatprep.subr.bf16.mxu1 %v349_v30 }
  0x28   :  { %352 = vmatpush3.bf16.msra.mxu1 %v351_v33 }
  0xf7   :  { %v115_v39 = vpop.f32.mrb[0].mxu0 }
  0xf8   :  { %v117_v41 = vpop.f32.mrb[1].mxu0 }
  0xf9   :  { %v122_v42 = vcombine.low %v115_v39, %v117_v41  ;;  %239 = vmatprep.mubr.f32.mxu1 %v117_v41 }
  0xfa   :  { %240 = vmatmul.mubr.f32.vlgmr.msra.gmra.mrb[0].mxu1 %v115_v39 }
  0xfb   :  { %v129_v43 = vrot.slane %v122_v42, %v128_v40 }
  0xfd   :  { %v136_v44 = vrot.slane %v129_v43, %v128_v40 }
  0xff   :  { %142 = vst.msk [vmem:[%s586_s3] sm:$0x3] %vm140_vm0, %v136_v44 }
 0x1cd   :  { %v286_v45 = vpop.f32.mrb[0].mxu1 }
 0x1ce   :  { %v287_v46 = vpop.f32.mrb[1].mxu1 }
 0x1cf   :  { %v288_v47 = vadd.f32 %v287_v46, %v286_v45 }
 0x1d1   :  { %245 = vst [vmem:[%s587_s4] sm:$0x1] %v288_v47 }

</bundles_post_ra>
